<compile_context>
chip_gen: v5e
topology: v5e:2x2
jax: 0.10.0
libtpu: 0.0.40
codegen_flags: <defaults>
</compile_context>

<pallas_src>
import functools

import jax
import jax.numpy as jnp
from jax.experimental import pallas as pl
from jax.experimental.pallas import tpu as pltpu


def _round_up(v, m):
    return ((v + m - 1) // m) * m


def depatch_kernel(x_ref, w_ref, b_ref, o_ref):
    # (tm, K) @ (K, tn) on the MXU with f32 accumulation, one bias add per tile.
    acc = jnp.dot(x_ref[...], w_ref[...], preferred_element_type=jnp.float32)
    o_ref[...] = (acc + b_ref[...]).astype(o_ref.dtype)


def _pick_tiles(M, K, Nout, in_bytes, out_bytes, budget=24 * 2**20):
    """Largest (tm, tn) whose double-buffered VMEM footprint fits the budget."""
    tn_candidates = [Nout] if Nout <= 2048 else [2048, 1024, 512, 256, 128]
    tm_candidates = [1024, 512, 256, 128, 64, 32, 16, 8]
    best = None
    for tn in tn_candidates:            # prefer wide tn: lane-dense stores, x read once
        for tm in tm_candidates:        # then the biggest M tile that still fits
            tm_eff = min(tm, M)
            fp = 2 * (tm_eff * K * in_bytes + K * tn * in_bytes
                      + tm_eff * tn * out_bytes + tn * 4)
            if fp <= budget:
                return tm_eff, tn, fp
            if best is None or fp < best[2]:
                best = (tm_eff, tn, fp)
    return best  # fallback: smallest footprint found


def _depatch_matmul(x2d, w2d, b2d, out_dtype):
    """out2d = x2d @ w2d + b2d, tiled over (M, Nout). Shapes already 128-padded."""
    M, K = x2d.shape
    _, Nout = w2d.shape

    in_bytes = jnp.dtype(x2d.dtype).itemsize
    out_bytes = jnp.dtype(out_dtype).itemsize
    tm, tn, footprint = _pick_tiles(M, K, Nout, in_bytes, out_bytes)

    grid_m = pl.cdiv(M, tm)
    grid_n = pl.cdiv(Nout, tn)

    # Scoped-VMEM limit: footprint + 50% headroom, clamped to safe chip budgets.
    vmem_limit = int(min(max(footprint + footprint // 2, 16 * 2**20), 48 * 2**20))

    cost = pl.CostEstimate(
        flops=2 * M * K * Nout,
        transcendentals=0,
        bytes_accessed=(grid_n * M * K * in_bytes      # x re-read per N tile
                        + K * Nout * in_bytes          # weights read once
                        + M * Nout * out_bytes         # output written once
                        + Nout * 4),
    )

    return pl.pallas_call(
        depatch_kernel,
        out_shape=jax.ShapeDtypeStruct((M, Nout), out_dtype),
        grid_spec=pltpu.PrefetchScalarGridSpec(
            num_scalar_prefetch=0,
            # N-tiles outer, M-tiles inner: weight/bias block indices are constant
            # across the inner axis, so they stay VMEM-resident over the M sweep.
            grid=(grid_n, grid_m),
            in_specs=[
                pl.BlockSpec((tm, K), lambda j, i: (i, 0)),   # activations
                pl.BlockSpec((K, tn), lambda j, i: (0, j)),   # weights
                pl.BlockSpec((1, tn), lambda j, i: (0, j)),   # bias row (f32)
            ],
            out_specs=pl.BlockSpec((tm, tn), lambda j, i: (i, j)),
        ),
        compiler_params=pltpu.CompilerParams(
            dimension_semantics=("parallel", "parallel"),  # no reduction axis in grid
            vmem_limit_bytes=vmem_limit,
        ),
        cost_estimate=cost,
    )(x2d, w2d, b2d)


@functools.partial(
    jax.jit,
    static_argnames=("image_size", "patch_size", "in_channels", "compute_dtype"),
)
def depatcher_forward(
    x, weight, bias, *, image_size, patch_size, in_channels,
    compute_dtype=jnp.bfloat16,
):
    """Pallas equivalent of dePatcher.forward.

    x:      (B, N, D)     token embeddings, N row-major over (H/p, W/p)
    weight: (D, C, p, p)  nn.ConvTranspose2d weight layout (in, out, kH, kW)
    bias:   (C,)
    returns (B, C, H, W)  NCHW, matching the PyTorch module
    """
    B, N, D = x.shape
    p = patch_size
    C = in_channels
    Hp = Wp = image_size // p
    assert N == Hp * Wp, "token count must match (H/p)*(W/p)"

    out_dtype = x.dtype
    Nout = C * p * p
    K_pad = _round_up(D, 128)        # full MXU rows
    Nout_pad = _round_up(Nout, 128)  # lane-dense output stores (no masked vst)

    # bf16 inputs for the MXU / halved DMA bytes; f32 accumulation inside the kernel.
    x2d = x.reshape(B * N, D).astype(compute_dtype)
    w2d = weight.reshape(D, Nout).astype(compute_dtype)
    b2d = jnp.repeat(bias.astype(jnp.float32), p * p).reshape(1, Nout)

    if K_pad != D:
        x2d = jnp.pad(x2d, ((0, 0), (0, K_pad - D)))
        w2d = jnp.pad(w2d, ((0, K_pad - D), (0, 0)))
    if Nout_pad != Nout:
        w2d = jnp.pad(w2d, ((0, 0), (0, Nout_pad - Nout)))
        b2d = jnp.pad(b2d, ((0, 0), (0, Nout_pad - Nout)))

    out2d = _depatch_matmul(x2d, w2d, b2d, out_dtype)

    if Nout_pad != Nout:
        out2d = out2d[:, :Nout]

    # TODO(synk): fuse this NCHW rearrangement into the output BlockSpec (grid over
    # (B, Hp) writing (C, p, W) slabs) to save one extra HBM round-trip of the output;
    # kept in XLA here because the in-kernel retile is layout-fragile at small p/Wp.
    out = out2d.reshape(B, Hp, Wp, C, p, p)
    out = out.transpose(0, 3, 1, 4, 2, 5).reshape(B, C, Hp * p, Wp * p)
    return out


if __name__ == "__main__":
    # Small, module-consistent shapes.
    in_channels = 4
    patch_size = 4
    emb_dim = 32
    image_size = 16
    B = 2
    N = (image_size // patch_size) ** 2  # 16 tokens

    key = jax.random.PRNGKey(0)
    kx, kw, kb = jax.random.split(key, 3)

    x = jax.random.normal(kx, (B, N, emb_dim), dtype=jnp.float32)
    # nn.ConvTranspose2d(emb_dim, in_channels, patch, patch) weight: (D, C, p, p)
    weight = jax.random.normal(
        kw, (emb_dim, in_channels, patch_size, patch_size), dtype=jnp.float32
    ) * 0.05
    bias = jax.random.normal(kb, (in_channels,), dtype=jnp.float32) * 0.05

    out = depatcher_forward(
        x, weight, bias,
        image_size=image_size, patch_size=patch_size, in_channels=in_channels,
    )
    out = jax.block_until_ready(out)

    # Pure-JAX reference of the stride==kernel conv-transpose semantics, using the
    # same bf16-cast inputs / f32 accumulation as the kernel.
    Hp = Wp = image_size // patch_size
    x_bf = x.astype(jnp.bfloat16).astype(jnp.float32)
    w_bf = weight.astype(jnp.bfloat16).astype(jnp.float32)
    ref = jnp.einsum("bnd,dcuv->bncuv", x_bf, w_bf) + bias[None, None, :, None, None]
    ref = ref.reshape(B, Hp, Wp, in_channels, patch_size, patch_size)
    ref = ref.transpose(0, 3, 1, 4, 2, 5).reshape(B, in_channels, image_size, image_size)

    assert out.shape == (B, in_channels, image_size, image_size)
    assert jnp.allclose(out, ref, atol=1e-2, rtol=1e-2), float(jnp.max(jnp.abs(out - ref)))

    print("KERNEL_OK")
</pallas_src>

<mosaic_0001>
module attributes {stable_mosaic.version = 11 : i64} {
  func.func @depatch_kernel(%arg0: i32, %arg1: i32, %arg2: memref<32x128xbf16, #tpu.memory_space<vmem>>, %arg3: memref<128x128xbf16, #tpu.memory_space<vmem>>, %arg4: memref<1x128xf32, #tpu.memory_space<vmem>>, %arg5: memref<32x128xf32, #tpu.memory_space<vmem>>) attributes {dimension_semantics = [#tpu.dimension_semantics<parallel>, #tpu.dimension_semantics<parallel>], iteration_bounds = array<i64: 1, 1>, scalar_prefetch = 0 : i64, scratch_operands = 0 : i64, tpu.core_type = #tpu.core_type<tc>, window_params = [{transform_indices = @transform_0, window_bounds = array<i64: 32, 128>}, {transform_indices = @transform_1, window_bounds = array<i64: 128, 128>}, {transform_indices = @transform_2, window_bounds = array<i64: 1, 128>}, {transform_indices = @transform_3, window_bounds = array<i64: 32, 128>}]} {
    %c0 = arith.constant 0 : index
    %c0_0 = arith.constant 0 : index
    %0 = vector.load %arg2[%c0, %c0_0] : memref<32x128xbf16, #tpu.memory_space<vmem>>, vector<32x128xbf16>
    %c0_1 = arith.constant 0 : index
    %c0_2 = arith.constant 0 : index
    %1 = vector.load %arg3[%c0_1, %c0_2] : memref<128x128xbf16, #tpu.memory_space<vmem>>, vector<128x128xbf16>
    %cst = arith.constant dense<0.000000e+00> : vector<32x128xf32>
    %2 = tpu.matmul %0, %1, %cst {dimension_numbers = #tpu.dot_dimension_numbers<[1], [0], [0], [1], [0, 0, 1, 1], [], []>} : vector<32x128xbf16>, vector<128x128xbf16>, vector<32x128xf32> -> vector<32x128xf32>
    %c0_3 = arith.constant 0 : index
    %c0_4 = arith.constant 0 : index
    %3 = vector.load %arg4[%c0_3, %c0_4] : memref<1x128xf32, #tpu.memory_space<vmem>>, vector<1x128xf32>
    %4 = vector.broadcast %3 : vector<1x128xf32> to vector<32x128xf32>
    %5 = arith.addf %2, %4 : vector<32x128xf32>
    %c0_5 = arith.constant 0 : index
    %c0_6 = arith.constant 0 : index
    %6 = vector.load %arg5[%c0_5, %c0_6] : memref<32x128xf32, #tpu.memory_space<vmem>>, vector<32x128xf32>
    tpu.vector_store %arg5[%c0_5, %c0_6], %5 {strides = array<i32>} : memref<32x128xf32, #tpu.memory_space<vmem>>, vector<32x128xf32>,
    return
  }
  func.func @transform_0(%arg0: i32, %arg1: i32) -> (i32, i32) {
    %c0_i32 = arith.constant 0 : i32
    %c0_i32_0 = arith.constant 0 : i32
    return %arg1, %c0_i32 : i32, i32
  }
  func.func @transform_1(%arg0: i32, %arg1: i32) -> (i32, i32) {
    %c0_i32 = arith.constant 0 : i32
    %c0_i32_0 = arith.constant 0 : i32
    return %c0_i32, %arg0 : i32, i32
  }
  func.func @transform_2(%arg0: i32, %arg1: i32) -> (i32, i32) {
    %c0_i32 = arith.constant 0 : i32
    %c0_i32_0 = arith.constant 0 : i32
    return %c0_i32, %arg0 : i32, i32
  }
  func.func @transform_3(%arg0: i32, %arg1: i32) -> (i32, i32) {
    %c0_i32 = arith.constant 0 : i32
    return %arg1, %arg0 : i32, i32
  }
}

</mosaic_0001>

<bundles_post_ra>
// kernel: depatcher_forward.1
= control target key start
LH: loop header
LB: loop body
LE: loop exit
PB: predicated region body
PF: predicated region fallthrough
CT: control target
= control target key end

     0   :  { %s249_s1 = inlined_call_operand.vmem [shape: bf16[128,128], index: 1, kind: input, shape index: {}]   ;;  %s250_s2 = inlined_call_operand.vmem [shape: f32[1,128], index: 2, kind: input, shape index: {}]   ;;  %s251_s0 = inlined_call_operand.vmem [shape: bf16[32,128], index: 0, kind: input, shape index: {}]   ;;  %s252_s3 = inlined_call_operand.vmem [shape: f32[32,128], index: 3, kind: output, shape index: {}]  }
   0x1   :  { %v174_v0 = vld [vmem:[%s249_s1 + $0x38] sm:$0xff]  ;;  %v173_v1 = vld [vmem:[%s249_s1 + $0x30] sm:$0xff]  ;;  %v172_v2 = vld [vmem:[%s249_s1 + $0x28] sm:$0xff] }
   0x2   :  { %98 = vmatpush.bf16.msra.mxu0 %v174_v0  ;;  %175 = vmatpush.bf16.msra.mxu1 %v174_v0  ;;  %v171_v3 = vld [vmem:[%s249_s1 + $0x20] sm:$0xff]  ;;  %v170_v4 = vld [vmem:[%s249_s1 + $0x18] sm:$0xff]  ;;  %v169_v5 = vld [vmem:[%s249_s1 + $0x10] sm:$0xff] }
   0x3   :  { %v168_v6 = vld [vmem:[%s249_s1 + $0x8] sm:$0xff]  ;;  %v167_v7 = vld [vmem:[%s249_s1] sm:$0xff] }
   0x4   :  { %v165_v8 = vld [vmem:[%s251_s0] sm:$0xff]  ;;  %v166_v9 = vld [vmem:[%s251_s0 + $0x8] sm:$0xff] }
   0x5   :  { %v183_v10 = vld [vmem:[%s250_s2] ss:$0 sm:$0xff] }
   0x6   :  { %99 = vmatpush.bf16.msra.mxu0 %v173_v1  ;;  %176 = vmatpush.bf16.msra.mxu1 %v173_v1 }
   0xa   :  { %100 = vmatpush.bf16.msra.mxu0 %v172_v2  ;;  %177 = vmatpush.bf16.msra.mxu1 %v172_v2 }
   0xe   :  { %101 = vmatpush.bf16.msra.mxu0 %v171_v3  ;;  %178 = vmatpush.bf16.msra.mxu1 %v171_v3 }
  0x12   :  { %102 = vmatpush.bf16.msra.mxu0 %v170_v4  ;;  %179 = vmatpush.bf16.msra.mxu1 %v170_v4 }
  0x16   :  { %103 = vmatpush.bf16.msra.mxu0 %v169_v5  ;;  %180 = vmatpush.bf16.msra.mxu1 %v169_v5 }
  0x1a   :  { %104 = vmatpush.bf16.msra.mxu0 %v168_v6  ;;  %181 = vmatpush.bf16.msra.mxu1 %v168_v6 }
  0x1e   :  { %105 = vmatpush.bf16.msra.mxu0 %v167_v7  ;;  %182 = vmatpush.bf16.msra.mxu1 %v167_v7 }
  0x21   :  { %106 = vmatmul.bf16.vlgmr.msra.gmra.mxu0 %v165_v8  ;;  %111 = vmatmul.bf16.vlgmr.msra.gmra.mxu1 %v166_v9 }
  0x9e   :  { %v107_v11 = vpop.f32.mrf.mxu0  ;;  %v112_v12 = vpop.f32.mrf.mxu1 }
  0x9f   :  { %v108_v13 = vadd.f32 %v183_v10, %v107_v11  ;;  %v113_v14 = vadd.f32 %v183_v10, %v112_v12 }
  0xa1   :  { %117 = vst [vmem:[%s252_s3] sm:$0xff] %v108_v13 }
  0xa2   :  { %119 = vst [vmem:[%s252_s3 + $0x10] sm:$0xff] %v113_v14 }
  0xa6   :  { %v109_v15 = vpop.f32.mrf.mxu0  ;;  %v114_v16 = vpop.f32.mrf.mxu1 }
  0xa7   :  { %v110_v17 = vadd.f32 %v183_v10, %v109_v15  ;;  %v115_v18 = vadd.f32 %v183_v10, %v114_v16 }
  0xa9   :  { %118 = vst [vmem:[%s252_s3 + $0x8] sm:$0xff] %v110_v17 }
  0xaa   :  { %120 = vst [vmem:[%s252_s3 + $0x18] sm:$0xff] %v115_v18 }

</bundles_post_ra>
